<compile_context>
chip_gen: v5e
topology: v5e:2x2
jax: 0.10.0
libtpu: 0.0.40
codegen_flags: <defaults>
</compile_context>

<pallas_src>
import math
import functools

import jax
import jax.numpy as jnp
from jax.experimental import pallas as pl
from jax.experimental.pallas import tpu as pltpu


def _mha_kernel(q_ref, kv_ref,
                wq_ref, bq_ref, wk_ref, bk_ref, wo_ref, bo_ref,
                o_ref, *, num_heads, d_k):
    """One grid step = one (batch, query-tile) pair.

    q_ref  : (1, TQ, D)  f32 query tile
    kv_ref : (1, 2*S, D) f32 [key; value] rows stacked along seq (fused so the
                          shared w_k projection is a single GEMM)
    w*_ref : (D, D) bf16, already transposed to (in, out); w_q pre-scaled by
             1/sqrt(d_k) (scale folded in the wrapper)
    b*_ref : (1, D) f32
    o_ref  : (1, TQ, D)
    """
    s_kv = kv_ref.shape[1] // 2

    q_in = q_ref[0].astype(jnp.bfloat16)        # (TQ, D)
    kv_in = kv_ref[0].astype(jnp.bfloat16)      # (2S, D)

    # Projections on the MXU (bf16 inputs, f32 accumulation). Weights are
    # pre-transposed; value shares w_k / b_k exactly like the PyTorch code.
    q = jnp.dot(q_in, wq_ref[...], preferred_element_type=jnp.float32) + bq_ref[...]
    kv = jnp.dot(kv_in, wk_ref[...], preferred_element_type=jnp.float32) + bk_ref[...]
    k = kv[:s_kv]
    v = kv[s_kv:]

    # Split heads once (static lane slice + major-axis stack) so attention runs
    # as a single head-batched einsum instead of num_heads tiny matmuls.
    def split_heads(x):  # (rows, D) -> (H, rows, d_k)
        return jnp.stack(
            [x[:, h * d_k:(h + 1) * d_k] for h in range(num_heads)], axis=0)

    qh = split_heads(q).astype(jnp.bfloat16)    # (H, TQ, d_k)
    kh = split_heads(k).astype(jnp.bfloat16)    # (H, S,  d_k)
    vh = split_heads(v).astype(jnp.bfloat16)    # (H, S,  d_k)

    # 1/sqrt(d_k) already folded into w_q / b_q -> no divide on the score block.
    scores = jnp.einsum('hqd,hkd->hqk', qh, kh,
                        preferred_element_type=jnp.float32)   # (H, TQ, S) f32
    scores = scores - jnp.max(scores, axis=-1, keepdims=True)
    p = jnp.exp(scores)
    # EUP reciprocal + VPU multiply instead of a vector divide.
    attn = p * pl.reciprocal(jnp.sum(p, axis=-1, keepdims=True), approx=True)

    ctx = jnp.einsum('hqk,hkd->hqd', attn.astype(jnp.bfloat16), vh,
                     preferred_element_type=jnp.float32)       # (H, TQ, d_k)

    # Merge heads back to (TQ, D) in registers (no VMEM scratch round-trip).
    merged = jnp.concatenate([ctx[h] for h in range(num_heads)], axis=-1)

    out = jnp.dot(merged.astype(jnp.bfloat16), wo_ref[...],
                  preferred_element_type=jnp.float32) + bo_ref[...]
    o_ref[0] = out.astype(o_ref.dtype)


def _choose_q_tile(seq_len):
    if seq_len <= 256:
        return seq_len
    for t in (256, 512, 128):        # MXU-friendly query tiles
        if seq_len % t == 0:
            return t
    return seq_len


def multi_head_attention(query, key, value, params, *, num_heads):
    """query/key/value: (B, S, D) float32. params: PyTorch-style Linear params."""
    B, S, D = query.shape
    assert D % num_heads == 0
    d_k = D // num_heads
    scale = math.sqrt(d_k)

    # Pre-transpose weights to (in, out), fold 1/sqrt(d_k) into w_q / b_q, and
    # cast weights to bf16 for the MXU; biases stay f32, added post-accumulate.
    wq_t = (params["w_q"].T / scale).astype(jnp.bfloat16)
    bq = (params["b_q"] / scale).reshape(1, D).astype(jnp.float32)
    wk_t = params["w_k"].T.astype(jnp.bfloat16)
    bk = params["b_k"].reshape(1, D).astype(jnp.float32)
    wo_t = params["w_o"].T.astype(jnp.bfloat16)
    bo = params["b_o"].reshape(1, D).astype(jnp.float32)

    # Fuse key/value rows so the shared w_k projection is one GEMM per step.
    kv = jnp.concatenate([key, value], axis=1)            # (B, 2S, D)

    tq = _choose_q_tile(S)
    n_q = S // tq
    grid = (B, n_q)

    kernel = functools.partial(_mha_kernel, num_heads=num_heads, d_k=d_k)

    q_spec = pl.BlockSpec((1, tq, D), lambda b, qi: (b, qi, 0))
    kv_spec = pl.BlockSpec((1, 2 * S, D), lambda b, qi: (b, 0, 0))
    w_spec = pl.BlockSpec((D, D), lambda b, qi: (0, 0))
    b_spec = pl.BlockSpec((1, D), lambda b, qi: (0, 0))
    out_spec = pl.BlockSpec((1, tq, D), lambda b, qi: (b, qi, 0))

    flops = 2 * B * (4 * S * D * D + 2 * S * S * D)
    transcendentals = B * num_heads * S * S
    bytes_accessed = (4 * B * S * D          # query (f32)
                      + 4 * B * 2 * S * D    # fused key/value (f32)
                      + 4 * B * S * D        # output (f32)
                      + 2 * 3 * D * D        # bf16 weights
                      + 4 * 3 * D)           # f32 biases

    return pl.pallas_call(
        kernel,
        out_shape=jax.ShapeDtypeStruct((B, S, D), query.dtype),
        grid_spec=pltpu.PrefetchScalarGridSpec(
            num_scalar_prefetch=0,
            grid=grid,
            in_specs=[q_spec, kv_spec,
                      w_spec, b_spec,   # w_q, b_q (pre-scaled)
                      w_spec, b_spec,   # w_k, b_k (used for both k and v)
                      w_spec, b_spec],  # w_o, b_o
            out_specs=out_spec,
        ),
        compiler_params=pltpu.CompilerParams(
            dimension_semantics=("parallel", "parallel")),
        cost_estimate=pl.CostEstimate(
            flops=flops, transcendentals=transcendentals,
            bytes_accessed=bytes_accessed),
    )(query, kv, wq_t, bq, wk_t, bk, wo_t, bo)


def _reference(query, key, value, params, *, num_heads):
    """Pure-JAX f32 reference mirroring the PyTorch forward exactly."""
    B, S, D = query.shape
    d_k = D // num_heads
    scale = math.sqrt(d_k)

    def lin(x, w, b):
        return x @ w.T + b

    q = lin(query, params["w_q"], params["b_q"])
    k = lin(key, params["w_k"], params["b_k"])
    v = lin(value, params["w_k"], params["b_k"])   # same quirk: w_k used for value

    def split(x):
        return x.reshape(B, S, num_heads, d_k).transpose(0, 2, 1, 3)  # (B, H, S, d_k)

    q, k, v = split(q), split(k), split(v)
    scores = jnp.einsum("bhqd,bhkd->bhqk", q, k) / scale
    attn = jax.nn.softmax(scores, axis=-1)
    x = jnp.einsum("bhqk,bhkd->bhqd", attn, v)
    x = x.transpose(0, 2, 1, 3).reshape(B, S, D)
    return lin(x, params["w_o"], params["b_o"])


def init_params(key, d_model):
    """Deterministic PyTorch-Linear-style init: U(-1/sqrt(fan_in), 1/sqrt(fan_in))."""
    bound = 1.0 / math.sqrt(d_model)
    keys = jax.random.split(key, 8)
    u = lambda k, shape: jax.random.uniform(k, shape, jnp.float32, -bound, bound)
    return {
        "w_q": u(keys[0], (d_model, d_model)), "b_q": u(keys[1], (d_model,)),
        "w_k": u(keys[2], (d_model, d_model)), "b_k": u(keys[3], (d_model,)),
        "w_v": u(keys[4], (d_model, d_model)), "b_v": u(keys[5], (d_model,)),  # unused in forward (module quirk)
        "w_o": u(keys[6], (d_model, d_model)), "b_o": u(keys[7], (d_model,)),
    }


if __name__ == "__main__":
    B, S, D, NH = 2, 8, 32, 4

    root = jax.random.PRNGKey(0)
    k_param, k_q, k_k, k_v = jax.random.split(root, 4)

    params = init_params(k_param, D)
    query = jax.random.normal(k_q, (B, S, D), jnp.float32)
    key_t = jax.random.normal(k_k, (B, S, D), jnp.float32)
    value = jax.random.normal(k_v, (B, S, D), jnp.float32)

    out = multi_head_attention(query, key_t, value, params, num_heads=NH)
    out = jax.block_until_ready(out)

    ref = _reference(query, key_t, value, params, num_heads=NH)
    assert out.shape == (B, S, D)
    # bf16 MXU inputs (f32 accumulate / f32 softmax) -> compare at bf16-level tolerance.
    assert jnp.allclose(out, ref, atol=2e-2, rtol=2e-2), "mismatch vs reference"

    print("KERNEL_OK")
</pallas_src>

<mosaic_0001>
module attributes {stable_mosaic.version = 11 : i64} {
  func.func @_mha_kernel(%arg0: i32, %arg1: i32, %arg2: memref<1x8x32xf32, #tpu.memory_space<vmem>>, %arg3: memref<1x16x32xf32, #tpu.memory_space<vmem>>, %arg4: memref<32x32xbf16, #tpu.memory_space<vmem>>, %arg5: memref<1x32xf32, #tpu.memory_space<vmem>>, %arg6: memref<32x32xbf16, #tpu.memory_space<vmem>>, %arg7: memref<1x32xf32, #tpu.memory_space<vmem>>, %arg8: memref<32x32xbf16, #tpu.memory_space<vmem>>, %arg9: memref<1x32xf32, #tpu.memory_space<vmem>>, %arg10: memref<1x8x32xf32, #tpu.memory_space<vmem>>) attributes {dimension_semantics = [#tpu.dimension_semantics<parallel>, #tpu.dimension_semantics<parallel>], iteration_bounds = array<i64: 2, 1>, scalar_prefetch = 0 : i64, scratch_operands = 0 : i64, tpu.core_type = #tpu.core_type<tc>, window_params = [{transform_indices = @transform_0, window_bounds = array<i64: 1, 8, 32>}, {transform_indices = @transform_1, window_bounds = array<i64: 1, 16, 32>}, {pipeline_mode = #tpu.pipeline_mode<synchronous>, transform_indices = @transform_2, window_bounds = array<i64: 32, 32>}, {pipeline_mode = #tpu.pipeline_mode<synchronous>, transform_indices = @transform_3, window_bounds = array<i64: 1, 32>}, {pipeline_mode = #tpu.pipeline_mode<synchronous>, transform_indices = @transform_4, window_bounds = array<i64: 32, 32>}, {pipeline_mode = #tpu.pipeline_mode<synchronous>, transform_indices = @transform_5, window_bounds = array<i64: 1, 32>}, {pipeline_mode = #tpu.pipeline_mode<synchronous>, transform_indices = @transform_6, window_bounds = array<i64: 32, 32>}, {pipeline_mode = #tpu.pipeline_mode<synchronous>, transform_indices = @transform_7, window_bounds = array<i64: 1, 32>}, {transform_indices = @transform_8, window_bounds = array<i64: 1, 8, 32>}]} {
    %c0 = arith.constant 0 : index
    %c0_0 = arith.constant 0 : index
    %c0_1 = arith.constant 0 : index
    %0 = vector.load %arg2[%c0, %c0_0, %c0_1] : memref<1x8x32xf32, #tpu.memory_space<vmem>>, vector<1x8x32xf32>
    %1 = vector.shape_cast %0 : vector<1x8x32xf32> to vector<8x32xf32>
    %2 = arith.truncf %1 : vector<8x32xf32> to vector<8x32xbf16>
    %c0_2 = arith.constant 0 : index
    %c0_3 = arith.constant 0 : index
    %c0_4 = arith.constant 0 : index
    %3 = vector.load %arg3[%c0_2, %c0_3, %c0_4] : memref<1x16x32xf32, #tpu.memory_space<vmem>>, vector<1x16x32xf32>
    %4 = vector.shape_cast %3 : vector<1x16x32xf32> to vector<16x32xf32>
    %5 = arith.truncf %4 : vector<16x32xf32> to vector<16x32xbf16>
    %c0_5 = arith.constant 0 : index
    %c0_6 = arith.constant 0 : index
    %6 = vector.load %arg4[%c0_5, %c0_6] : memref<32x32xbf16, #tpu.memory_space<vmem>>, vector<32x32xbf16>
    %cst = arith.constant dense<0.000000e+00> : vector<8x32xf32>
    %7 = tpu.matmul %2, %6, %cst {dimension_numbers = #tpu.dot_dimension_numbers<[1], [0], [0], [1], [0, 0, 1, 1], [], []>} : vector<8x32xbf16>, vector<32x32xbf16>, vector<8x32xf32> -> vector<8x32xf32>
    %c0_7 = arith.constant 0 : index
    %c0_8 = arith.constant 0 : index
    %8 = vector.load %arg5[%c0_7, %c0_8] : memref<1x32xf32, #tpu.memory_space<vmem>>, vector<1x32xf32>
    %9 = vector.broadcast %8 : vector<1x32xf32> to vector<8x32xf32>
    %10 = arith.addf %7, %9 : vector<8x32xf32>
    %c0_9 = arith.constant 0 : index
    %c0_10 = arith.constant 0 : index
    %11 = vector.load %arg6[%c0_9, %c0_10] : memref<32x32xbf16, #tpu.memory_space<vmem>>, vector<32x32xbf16>
    %cst_11 = arith.constant dense<0.000000e+00> : vector<16x32xf32>
    %12 = tpu.matmul %5, %11, %cst_11 {dimension_numbers = #tpu.dot_dimension_numbers<[1], [0], [0], [1], [0, 0, 1, 1], [], []>} : vector<16x32xbf16>, vector<32x32xbf16>, vector<16x32xf32> -> vector<16x32xf32>
    %c0_12 = arith.constant 0 : index
    %c0_13 = arith.constant 0 : index
    %13 = vector.load %arg7[%c0_12, %c0_13] : memref<1x32xf32, #tpu.memory_space<vmem>>, vector<1x32xf32>
    %14 = vector.broadcast %13 : vector<1x32xf32> to vector<16x32xf32>
    %15 = arith.addf %12, %14 : vector<16x32xf32>
    %16 = vector.extract_strided_slice %15 {offsets = [0, 0], sizes = [8, 32], strides = [1, 1]} : vector<16x32xf32> to vector<8x32xf32>
    %17 = vector.extract_strided_slice %15 {offsets = [8, 0], sizes = [8, 32], strides = [1, 1]} : vector<16x32xf32> to vector<8x32xf32>
    %18 = vector.extract_strided_slice %10 {offsets = [0, 0], sizes = [8, 8], strides = [1, 1]} : vector<8x32xf32> to vector<8x8xf32>
    %19 = vector.extract_strided_slice %10 {offsets = [0, 8], sizes = [8, 8], strides = [1, 1]} : vector<8x32xf32> to vector<8x8xf32>
    %20 = vector.extract_strided_slice %10 {offsets = [0, 16], sizes = [8, 8], strides = [1, 1]} : vector<8x32xf32> to vector<8x8xf32>
    %21 = vector.extract_strided_slice %10 {offsets = [0, 24], sizes = [8, 8], strides = [1, 1]} : vector<8x32xf32> to vector<8x8xf32>
    %22 = vector.shape_cast %18 : vector<8x8xf32> to vector<1x8x8xf32>
    %23 = vector.shape_cast %19 : vector<8x8xf32> to vector<1x8x8xf32>
    %24 = vector.shape_cast %20 : vector<8x8xf32> to vector<1x8x8xf32>
    %25 = vector.shape_cast %21 : vector<8x8xf32> to vector<1x8x8xf32>
    %26 = tpu.concatenate %22, %23, %24, %25 in 0 : vector<1x8x8xf32>, vector<1x8x8xf32>, vector<1x8x8xf32>, vector<1x8x8xf32> -> vector<4x8x8xf32>
    %27 = arith.truncf %26 : vector<4x8x8xf32> to vector<4x8x8xbf16>
    %28 = vector.extract_strided_slice %16 {offsets = [0, 0], sizes = [8, 8], strides = [1, 1]} : vector<8x32xf32> to vector<8x8xf32>
    %29 = vector.extract_strided_slice %16 {offsets = [0, 8], sizes = [8, 8], strides = [1, 1]} : vector<8x32xf32> to vector<8x8xf32>
    %30 = vector.extract_strided_slice %16 {offsets = [0, 16], sizes = [8, 8], strides = [1, 1]} : vector<8x32xf32> to vector<8x8xf32>
    %31 = vector.extract_strided_slice %16 {offsets = [0, 24], sizes = [8, 8], strides = [1, 1]} : vector<8x32xf32> to vector<8x8xf32>
    %32 = vector.shape_cast %28 : vector<8x8xf32> to vector<1x8x8xf32>
    %33 = vector.shape_cast %29 : vector<8x8xf32> to vector<1x8x8xf32>
    %34 = vector.shape_cast %30 : vector<8x8xf32> to vector<1x8x8xf32>
    %35 = vector.shape_cast %31 : vector<8x8xf32> to vector<1x8x8xf32>
    %36 = tpu.concatenate %32, %33, %34, %35 in 0 : vector<1x8x8xf32>, vector<1x8x8xf32>, vector<1x8x8xf32>, vector<1x8x8xf32> -> vector<4x8x8xf32>
    %37 = arith.truncf %36 : vector<4x8x8xf32> to vector<4x8x8xbf16>
    %38 = vector.extract_strided_slice %17 {offsets = [0, 0], sizes = [8, 8], strides = [1, 1]} : vector<8x32xf32> to vector<8x8xf32>
    %39 = vector.extract_strided_slice %17 {offsets = [0, 8], sizes = [8, 8], strides = [1, 1]} : vector<8x32xf32> to vector<8x8xf32>
    %40 = vector.extract_strided_slice %17 {offsets = [0, 16], sizes = [8, 8], strides = [1, 1]} : vector<8x32xf32> to vector<8x8xf32>
    %41 = vector.extract_strided_slice %17 {offsets = [0, 24], sizes = [8, 8], strides = [1, 1]} : vector<8x32xf32> to vector<8x8xf32>
    %42 = vector.shape_cast %38 : vector<8x8xf32> to vector<1x8x8xf32>
    %43 = vector.shape_cast %39 : vector<8x8xf32> to vector<1x8x8xf32>
    %44 = vector.shape_cast %40 : vector<8x8xf32> to vector<1x8x8xf32>
    %45 = vector.shape_cast %41 : vector<8x8xf32> to vector<1x8x8xf32>
    %46 = tpu.concatenate %42, %43, %44, %45 in 0 : vector<1x8x8xf32>, vector<1x8x8xf32>, vector<1x8x8xf32>, vector<1x8x8xf32> -> vector<4x8x8xf32>
    %47 = arith.truncf %46 : vector<4x8x8xf32> to vector<4x8x8xbf16>
    "tpu.trace_start"() <{level = 10 : i32, message = "hqd,hkd->hqk"}> : () -> ()
    %cst_14 = arith.constant dense<0.000000e+00> : vector<4x8x8xf32>
    %48 = tpu.matmul %27, %37, %cst_14 {dimension_numbers = #tpu.dot_dimension_numbers<[2], [2], [1], [1], [0, 0, 0, 1, 1, 1], [0], [0]>} : vector<4x8x8xbf16>, vector<4x8x8xbf16>, vector<4x8x8xf32> -> vector<4x8x8xf32>
    "tpu.trace_stop"() : () -> ()
    %cst_15 = arith.constant dense<0xFF800000> : vector<4x8xf32>
    %49 = vector.multi_reduction <maximumf>, %48, %cst_15 [2] : vector<4x8x8xf32> to vector<4x8xf32>
    %50 = vector.shape_cast %49 : vector<4x8xf32> to vector<4x8x1xf32>
    %51 = vector.broadcast %50 : vector<4x8x1xf32> to vector<4x8x8xf32>
    %52 = arith.subf %48, %51 : vector<4x8x8xf32>
    %53 = math.exp %52 : vector<4x8x8xf32>
    %cst_16 = arith.constant dense<0.000000e+00> : vector<4x8xf32>
    %54 = vector.multi_reduction <add>, %53, %cst_16 [2] : vector<4x8x8xf32> to vector<4x8xf32>
    %55 = vector.shape_cast %54 : vector<4x8xf32> to vector<4x8x1xf32>
    %56 = tpu.reciprocal %55 {approx = true} : vector<4x8x1xf32> -> vector<4x8x1xf32>
    %57 = vector.broadcast %56 : vector<4x8x1xf32> to vector<4x8x8xf32>
    %58 = arith.mulf %53, %57 : vector<4x8x8xf32>
    %59 = arith.truncf %58 : vector<4x8x8xf32> to vector<4x8x8xbf16>
    "tpu.trace_start"() <{level = 10 : i32, message = "hqk,hkd->hqd"}> : () -> ()
    %cst_17 = arith.constant dense<0.000000e+00> : vector<4x8x8xf32>
    %60 = tpu.matmul %59, %47, %cst_17 {dimension_numbers = #tpu.dot_dimension_numbers<[2], [1], [1], [2], [0, 0, 0, 1, 1, 2], [0], [0]>} : vector<4x8x8xbf16>, vector<4x8x8xbf16>, vector<4x8x8xf32> -> vector<4x8x8xf32>
    "tpu.trace_stop"() : () -> ()
    %61 = vector.extract_strided_slice %60 {offsets = [0, 0, 0], sizes = [1, 8, 8], strides = [1, 1, 1]} : vector<4x8x8xf32> to vector<1x8x8xf32>
    %62 = vector.shape_cast %61 : vector<1x8x8xf32> to vector<8x8xf32>
    %63 = vector.extract_strided_slice %60 {offsets = [1, 0, 0], sizes = [1, 8, 8], strides = [1, 1, 1]} : vector<4x8x8xf32> to vector<1x8x8xf32>
    %64 = vector.shape_cast %63 : vector<1x8x8xf32> to vector<8x8xf32>
    %65 = vector.extract_strided_slice %60 {offsets = [2, 0, 0], sizes = [1, 8, 8], strides = [1, 1, 1]} : vector<4x8x8xf32> to vector<1x8x8xf32>
    %66 = vector.shape_cast %65 : vector<1x8x8xf32> to vector<8x8xf32>
    %67 = vector.extract_strided_slice %60 {offsets = [3, 0, 0], sizes = [1, 8, 8], strides = [1, 1, 1]} : vector<4x8x8xf32> to vector<1x8x8xf32>
    %68 = vector.shape_cast %67 : vector<1x8x8xf32> to vector<8x8xf32>
    %69 = tpu.concatenate %62, %64, %66, %68 in 1 : vector<8x8xf32>, vector<8x8xf32>, vector<8x8xf32>, vector<8x8xf32> -> vector<8x32xf32>
    %70 = arith.truncf %69 : vector<8x32xf32> to vector<8x32xbf16>
    %c0_18 = arith.constant 0 : index
    %c0_19 = arith.constant 0 : index
    %71 = vector.load %arg8[%c0_18, %c0_19] : memref<32x32xbf16, #tpu.memory_space<vmem>>, vector<32x32xbf16>
    %cst_20 = arith.constant dense<0.000000e+00> : vector<8x32xf32>
    %72 = tpu.matmul %70, %71, %cst_20 {dimension_numbers = #tpu.dot_dimension_numbers<[1], [0], [0], [1], [0, 0, 1, 1], [], []>} : vector<8x32xbf16>, vector<32x32xbf16>, vector<8x32xf32> -> vector<8x32xf32>
    %c0_21 = arith.constant 0 : index
    %c0_22 = arith.constant 0 : index
    %73 = vector.load %arg9[%c0_21, %c0_22] : memref<1x32xf32, #tpu.memory_space<vmem>>, vector<1x32xf32>
    %74 = vector.broadcast %73 : vector<1x32xf32> to vector<8x32xf32>
    %75 = arith.addf %72, %74 : vector<8x32xf32>
    %c0_23 = arith.constant 0 : index
    %c0_24 = arith.constant 0 : index
    %c0_25 = arith.constant 0 : index
    %76 = vector.load %arg10[%c0_23, %c0_24, %c0_25] : memref<1x8x32xf32, #tpu.memory_space<vmem>>, vector<1x8x32xf32>
    %77 = vector.shape_cast %76 : vector<1x8x32xf32> to vector<8x32xf32>
    %78 = vector.shape_cast %75 : vector<8x32xf32> to vector<1x8x32xf32>
    tpu.vector_store %arg10[%c0_23, %c0_24, %c0_25], %78 {strides = array<i32>} : memref<1x8x32xf32, #tpu.memory_space<vmem>>, vector<1x8x32xf32>,
    return
  }
  func.func @transform_0(%arg0: i32, %arg1: i32) -> (i32, i32, i32) {
    %c0_i32 = arith.constant 0 : i32
    %c0_i32_0 = arith.constant 0 : i32
    return %arg0, %arg1, %c0_i32 : i32, i32, i32
  }
  func.func @transform_1(%arg0: i32, %arg1: i32) -> (i32, i32, i32) {
    %c0_i32 = arith.constant 0 : i32
    %c0_i32_0 = arith.constant 0 : i32
    %c0_i32_1 = arith.constant 0 : i32
    return %arg0, %c0_i32, %c0_i32_0 : i32, i32, i32
  }
  func.func @transform_2(%arg0: i32, %arg1: i32) -> (i32, i32) {
    %c0_i32 = arith.constant 0 : i32
    %c0_i32_0 = arith.constant 0 : i32
    %c0_i32_1 = arith.constant 0 : i32
    return %c0_i32, %c0_i32_0 : i32, i32
  }
  func.func @transform_3(%arg0: i32, %arg1: i32) -> (i32, i32) {
    %c0_i32 = arith.constant 0 : i32
    %c0_i32_0 = arith.constant 0 : i32
    %c0_i32_1 = arith.constant 0 : i32
    return %c0_i32, %c0_i32_0 : i32, i32
  }
  func.func @transform_4(%arg0: i32, %arg1: i32) -> (i32, i32) {
    %c0_i32 = arith.constant 0 : i32
    %c0_i32_0 = arith.constant 0 : i32
    %c0_i32_1 = arith.constant 0 : i32
    return %c0_i32, %c0_i32_0 : i32, i32
  }
  func.func @transform_5(%arg0: i32, %arg1: i32) -> (i32, i32) {
    %c0_i32 = arith.constant 0 : i32
    %c0_i32_0 = arith.constant 0 : i32
    %c0_i32_1 = arith.constant 0 : i32
    return %c0_i32, %c0_i32_0 : i32, i32
  }
  func.func @transform_6(%arg0: i32, %arg1: i32) -> (i32, i32) {
    %c0_i32 = arith.constant 0 : i32
    %c0_i32_0 = arith.constant 0 : i32
    %c0_i32_1 = arith.constant 0 : i32
    return %c0_i32, %c0_i32_0 : i32, i32
  }
  func.func @transform_7(%arg0: i32, %arg1: i32) -> (i32, i32) {
    %c0_i32 = arith.constant 0 : i32
    %c0_i32_0 = arith.constant 0 : i32
    %c0_i32_1 = arith.constant 0 : i32
    return %c0_i32, %c0_i32_0 : i32, i32
  }
  func.func @transform_8(%arg0: i32, %arg1: i32) -> (i32, i32, i32) {
    %c0_i32 = arith.constant 0 : i32
    %c0_i32_0 = arith.constant 0 : i32
    return %arg0, %arg1, %c0_i32 : i32, i32, i32
  }
}

</mosaic_0001>

<bundles_post_ra>
// kernel: tpu_custom_call.1
= control target key start
LH: loop header
LB: loop body
LE: loop exit
PB: predicated region body
PF: predicated region fallthrough
CT: control target
= control target key end

     0   :  { %s1694_s0 = inlined_call_operand.hbm [shape: f32[2,8,32], index: 0, kind: input, shape index: {}]   ;;  %s1695_s1 = inlined_call_operand.hbm [shape: f32[2,16,32], index: 1, kind: input, shape index: {}]   ;;  %s1696_s2 = inlined_call_operand.hbm [shape: bf16[32,32], index: 2, kind: input, shape index: {}]   ;;  %s1697_s3 = inlined_call_operand.vmem [shape: f32[1,32], index: 3, kind: input, shape index: {}]   ;;  %s1698_s4 = inlined_call_operand.hbm [shape: bf16[32,32], index: 4, kind: input, shape index: {}]   ;;  %s1699_s5 = inlined_call_operand.vmem [shape: f32[1,32], index: 5, kind: input, shape index: {}]   ;;  %s1700_s6 = inlined_call_operand.hbm [shape: bf16[32,32], index: 6, kind: input, shape index: {}]   ;;  %s1701_s7 = inlined_call_operand.vmem [shape: f32[1,32], index: 7, kind: input, shape index: {}]   ;;  %s1702_s8 = inlined_call_operand.hbm [shape: f32[2,8,32], index: 8, kind: output, shape index: {}]  }
   0x1   :  { %1706 = sst [smem:[#allocation21_spill]] %s1694_s0 }
   0x2   :  { %1707 = sst [smem:[#allocation22_spill]] %s1696_s2 }
   0x3   :  { %1708 = sst [smem:[#allocation23_spill]] %s1698_s4 }
   0x4   :  { %1709 = sst [smem:[#allocation24_spill]] %s1700_s6 }
   0x5   :  { %13 = vsyncpa [#allocation3], 0 }
   0x6   :  { %15 = vsyncpa [#allocation3 + $0x1], 0 }
   0x7   :  { %16 = vsyncpa [#allocation6], 0 }
   0x8   :  { %18 = vsyncpa [#allocation6 + $0x1], 0 }
   0x9   :  { %19 = vsyncpa [#allocation9], 0 }
   0xa   :  { %20 = vsyncpa [#allocation4], 0 }
   0xb   :  { %22 = vsyncpa [#allocation4 + $0x1], 0  ;;  %s1454_s27 = smov 0   ;;  %s1456_s28 = smov 0  }
   0xc   :  { %s1458_s29 = smov 0   ;;  %s1460_s30 = smov 0  }
   0xd   :  { %s1462_s9 = smov 0   ;;  %s1464_s10 = smov 0  }
   0xe LB: > { %1710 = sst [smem:[#allocation17_spill]] %s1382_s29  ;;  %s1485_s11 = sadd.s32 4294967295, %s1394_s10   ;;  %s1394_s10 = sphi %s1464_s10, %s28_s10   ;;  %s1390_s9 = sphi %s1462_s9, %s1732_s9   ;;  %s1386_s30 = sphi %s1460_s30, %s1731_s30   ;;  %s1382_s29 = sphi %s1458_s29, %s1727_s29   ;;  %s1378_s28 = sphi %s1456_s28, %s1730_s28   ;;  %s1374_s27 = sphi %s1454_s27, %s1729_s27  }
   0xf   : > { %p960_p0 = scmp.ge.s32.totalorder %s1394_s10, 1  ;;  %p63_p1 = scmp.eq.s32.totalorder %s1485_s11, 0 }
  0x10   : > { %p253_p2 = scmp.lt.s32.totalorder %s1394_s10, 3  ;;  %s1711_s2 = sld [smem:[#allocation22_spill]] }
  0x11   : > { %s1396_s16 = smov [#allocation7]   ;;  %p964_p6 = scmp.ge.s32.totalorder %s1394_s10, 2 }
  0x12   : > { %p1493_p3 = pnand %p960_p0, %p253_p2  ;;  %s266_s17 = sshll.u32 %s1396_s16, 4  ;;  %s267_s17 = int_to_ptr.vmem [resolvable:$true] %s266_s17 }
  0x13   : > { %s1714_s4 = sld [smem:[#allocation23_spill]]  ;;  %s1397_s22 = smov 64  }
  0x14   : > { %p1041_p4 = pneg %p1493_p3  ;;  %s1398_s23 = smov 4  }
  0x15   : > { %s1399_s24 = smov [#allocation8]   ;;  %s1715_s6 = sld [smem:[#allocation24_spill]] }
  0x16   : > { %s264_s14 = sshll.u32 %s1711_s2, 4  ;;  %p1501_p5 = pnand %p1041_p4, %p63_p1  ;;  %s265_s14 = int_to_ptr.hbm [resolvable:$true] %s264_s14 }
  0x17   : > { %s283_s25 = sshll.u32 %s1399_s24, 4  ;;  %s1400_s16 = smov [#allocation10]   ;;  %s284_s25 = int_to_ptr.vmem [resolvable:$true] %s283_s25 }
  0x18   : > { %1044 = dma.hbm_to_vmem [thread:$0]  (!%p1501_p5), %s265_s14, 256, %s267_s17, [#allocation6], %s1397_s22, %s1397_s22, %s1398_s23  }
  0x19   : > { %s281_s21 = sshll.u32 %s1714_s4, 4  ;;  %s300_s19 = sshll.u32 %s1400_s16, 4  ;;  %s282_s21 = int_to_ptr.hbm [resolvable:$true] %s281_s21  ;;  %s301_s19 = int_to_ptr.vmem [resolvable:$true] %s300_s19 }
  0x1a   : > { %1047 = dma.hbm_to_vmem [thread:$0]  (!%p1501_p5), %s282_s21, 256, %s284_s25, [#allocation9], %s1397_s22, %s1397_s22, %s1398_s23  }
  0x1b   : > { %s298_s13 = sshll.u32 %s1715_s6, 4  ;;  %s959_s14 = sadd.s32 4294967294, %s1394_s10   ;;  %s299_s13 = int_to_ptr.hbm [resolvable:$true] %s298_s13 }
  0x1c   : > { %1050 = dma.hbm_to_vmem [thread:$0]  (!%p1501_p5), %s299_s13, 256, %s301_s19, [#allocation9], %s1397_s22, %s1397_s22, %s1398_s23  }
  0x1d   : > { %s40_s17 = sadd.s32 1, %s1390_s9  ;;  %s49_s20 = sadd.s32 1, %s1382_s29 }
  0x1e   : > { %p42_p7 = scmp.ge.s32.totalorder %s40_s17, 2  ;;  %p56_p8 = scmp.ne.s32.totalorder %s1382_s29, %s1378_s28 }
  0x1f   : > { %p57_p9 = scmp.eq.s32.totalorder %s1394_s10, 0  ;;  %p62_p10 = scmp.ne.s32.totalorder %s1378_s28, %s1374_s27 }
  0x20   : > { %s1734_s17 = smov (%p42_p7, %s40_s17), 0  ;;  %p240_p13 = scmp.eq.s32.totalorder %s1485_s11, 1 }
  0x21   : > { %1716 = sst [smem:[#allocation18_spill]] %s1734_s17  ;;  %p1528_p11 = por %p57_p9, %p56_p8 }
  0x22   : > { %p1534_p12 = por %p63_p1, %p62_p10  ;;  %s44_s22 = ssub.s32 %s1390_s9, %s1734_s17 }
  0x23   : > { %p47_p0 = scmp.eq.s32.totalorder %s44_s22, 0  ;;  %p246_p2 = scmp.eq.s32.totalorder %s959_s14, 1 }
  0x24   : > { %p1541_p4 = por %p240_p13, %p56_p8  ;;  %p1065_p5 = scmp.lt.s32.totalorder %s1394_s10, 2 }
  0x25   : > { %s1547_s24 = scalar_select %p47_p0, %s1382_s29, %s49_s20  }
  0x26   : > { %p1549_p7 = por %p246_p2, %p62_p10  ;;  %s317_s26 = sand.u32 1, %s1382_s29  }
  0x27   : > { %1720 = sst [smem:[#allocation19_spill]] %s1547_s24  ;;  %s965_s12 = sshll.u32 %s317_s26, 3 }
  0x28   : > { %s1721_s25 = scalar_select %p1549_p7, 1, 0 }
  0x29   : > { %s966_s13 = sshll.u32 %s1390_s9, 3  ;;  %s1723_s0 = sld [smem:[#allocation21_spill]] }
  0x2a   : > { %1722 = sst [smem:[#allocation20_spill]] %s1721_s25  ;;  %s321_s22 = scalar_lea.vmem [#allocation2], %s965_s12 }
  0x2b   : > { %s330_s2 = sshll.u32 %s321_s22, 4  ;;  %p1560_p8 = pnand %p1065_p5, %p1528_p11  ;;  %s331_s2 = int_to_ptr.vmem [resolvable:$true] %s330_s2 }
  0x2c   : > { %s967_s6 = sshll.u32 %s317_s26, 4  ;;  %s1016_s17 = sshll.u32 %s1390_s9, 4 }
  0x2d   : > { %s318_s24 = scalar_lea.sflag [#allocation3], %s317_s26  ;;  %s341_s29 = scalar_lea.vmem [#allocation5], %s967_s6 }
  0x2e   : > { %s349_s16 = sshll.u32 %s341_s29, 4  ;;  %s1402_s25 = smov 8   ;;  %s350_s16 = int_to_ptr.vmem [resolvable:$true] %s349_s16 }
  0x2f   : > { %s326_s14 = scalar_lea.hbm %s1723_s0, %s966_s13  ;;  %s337_s13 = sand.u32 1, %s1394_s10  }
  0x30   : > { %s328_s4 = sshll.u32 %s326_s14, 4  ;;  %s346_s14 = scalar_lea.hbm %s1695_s1, %s1016_s17  ;;  %s329_s4 = int_to_ptr.hbm [resolvable:$true] %s328_s4 }
  0x31   : > { %1054 = dma.hbm_to_vmem [thread:$0]  (!%p1560_p8), %s329_s4, 128, %s331_s2, %s318_s24  }
  0x32   : > { %s347_s21 = sshll.u32 %s346_s14, 4  ;;  %s338_s22 = scalar_lea.sflag [#allocation6], %s337_s13  ;;  %s348_s21 = int_to_ptr.hbm [resolvable:$true] %s347_s21 }
  0x33   : > { %s1401_s0 = smov 128   ;;  %361 = sbr.rel (%p1493_p3) target bundleno = 1121 (0x461), region = 52 }
  0x34   : > { %1057 = dma.hbm_to_vmem [thread:$0]  (!%p1560_p8), %s348_s21, 256, %s350_s16, %s338_s22, %s1401_s0, %s1401_s0, %s1402_s25  }
  0x35   : > { %s1576_s2 = sand.u32 (!%p1493_p3), 1, %s1378_s28  }
  0x36   : > { %s971_s4 = sshll.u32 (!%p1493_p3), %s1576_s2, 3  ;;  %s364_s6 = scalar_lea.sflag (!%p1493_p3), [#allocation3], %s1576_s2 }
  0x37   : > { %s367_s29 = scalar_lea.vmem (!%p1493_p3), [#allocation2], %s971_s4 }
  0x38   : > { %1353 = dma.done.wait (%p1534_p12), %s364_s6, 128  }
  0x39   : > { %1355 = vsyncadd (%p1534_p12), %s364_s6, 4294967168  ;;  %s373_s0 = sand.u32 1, %s1485_s11   ;;  %s972_s15 = sshll.u32 %s1576_s2, 4 }
  0x3a   : > { %s374_s17 = scalar_lea.sflag [#allocation6], %s373_s0  ;;  %s377_s24 = scalar_lea.vmem [#allocation5], %s972_s15 }
  0x3b   : > { %1357 = dma.done.wait (%p1534_p12), %s374_s17, 256  }
  0x3c   : > { %1359 = vsyncadd (%p1534_p12), %s374_s17, 4294967040 }
  0x3d   : > { %1361 = dma.done.wait (%p63_p1), [#allocation6], 256  }
  0x3e   : > { %1363 = vsyncadd (%p63_p1), [#allocation6], 4294967040 }
  0x3f   : > { %1365 = dma.done.wait (%p63_p1), [#allocation9], 512  }
  0x40   : > { %1367 = vsyncadd (%p63_p1), [#allocation9], 4294966784  ;;  %v1020_v0 = vld [vmem:[#allocation8 + $0x8] sm:$0xff]  ;;  %v1019_v1 = vld [vmem:[#allocation8] sm:$0xff]  ;;  %vm457_vm0 = vcmask 261120   ;;  %vm553_vm1 = vcmask 64512  }
  0x41   : > { %v434_v2 = vld [vmem:[%s377_s24] sm:$0xff]  ;;  %v1018_v3 = vld [vmem:[#allocation7 + $0x8] sm:$0xff]  ;;  %503 = vmatpush.bf16.msra.mxu1 %v1020_v0  ;;  %v432_v6 = vld [vmem:[%s367_s29] sm:$0xff]  ;;  %s1403_s20 = smov 112   ;;  %s1404_s16 = smov 120   ;;  %vm681_vm2 = vcmask 1043456  }
  0x42   : > { %v435_v4 = vld [vmem:[%s377_s24 + $0x8] sm:$0xff]  ;;  %v1017_v5 = vld [vmem:[#allocation7] sm:$0xff]  ;;  %467 = vmatpush.bf16.msra.mxu0 %v1018_v3  ;;  %v433_v8 = vpack.c.bf16 %v432_v6, %v432_v6  ;;  %v1131_v9 = vld [vmem:[%s1699_s5] ss:$0 sm:$0xff]  ;;  %s1405_s13 = smov 104   ;;  %s1406_s12 = smov 16  }
  0x43   : > { %v436_v7 = vpack.c.bf16 %v435_v4, %v434_v2  ;;  %v1132_v10 = vld [vmem:[%s1697_s3] ss:$0 sm:$0xff]  ;;  %s1407_s19 = smov 8   ;;  %s1408_s14 = smov 24   ;;  %vm768_vm3 = vcmask 130048   ;;  %vm770_vm4 = vcmask 195584  }
  0x44   : > { %s1013_s21 = sshll.u32 %s1386_s30, 3  ;;  %s430_s17 = scalar_lea.vmem [#allocation11], %s971_s4 }
  0x45   : > { %504 = vmatpush.bf16.msra.mxu1 %v1019_v1  ;;  %s822_s29 = scalar_lea.hbm %s1702_s8, %s1013_s21  ;;  %s824_s24 = sshll.u32 %s430_s17, 4  ;;  %s825_s24 = int_to_ptr.vmem [resolvable:$true] %s824_s24 }
  0x46   : > { %468 = vmatpush.bf16.msra.mxu0 %v1017_v5  ;;  %s826_s11 = sshll.u32 %s822_s29, 4  ;;  %s811_s30 = scalar_lea.sflag [#allocation4], %s1576_s2  ;;  %s827_s11 = int_to_ptr.hbm [resolvable:$true] %s826_s11 }
  0x47   : > { %s1314_s18 = sshra.s32 %s827_s11, 4  ;;  %s1320_s4 = scalar_lea.hbm %s1702_s8, 16  ;;  %s1315_s18 = int_to_ptr.hbm [resolvable:$true] %s1314_s18 }
  0x48   : > { %994 = vmatmul.msk.bf16.vlgmr.msra.gmra.mxu1 %vm457_vm0, %v436_v7  ;;  %s1316_s25 = scalar_lea.hbm %s1315_s18, 8  ;;  %p1321_p10 = scmp.lt.s32.totalorder %s1315_s18, %s1702_s8 }
  0x49   : > { %985 = vmatmul.msk.bf16.vlgmr.msra.gmra.mxu0 %vm457_vm0, %v433_v8  ;;  %p1317_p1 = scmp.ne.s32.totalorder %s1315_s18, %s1316_s25  ;;  %p1322_p11 = scmp.lt.s32.totalorder %s1320_s4, %s1316_s25 }
  0x4b   : > { %p1318_p3 = pnand %p1317_p1, %p1541_p4  ;;  %p1323_p12 = por %p1322_p11, %p1321_p10 }
  0x4d   : > { %p1319_p9 = pneg %p1318_p3 }
  0x4f   : > { %p1324_p13 = pnand %p1323_p12, %p1319_p9 }
  0xc5   : > { %v506_v11 = vpop.f32.mrf.mxu1 }
  0xc6   : > { %v507_v12 = vadd.f32 %v1131_v9, %v506_v11  ;;  %v470_v13 = vpop.f32.mrf.mxu0 }
  0xc7   : > { %v471_v14 = vadd.f32 %v1132_v10, %v470_v13 }
  0xc8   : > { %529 = vrot.lane.b32.xlu1 %v507_v12, %s1403_s20  ;;  %526 = vrot.lane.b32.xlu0 %v507_v12, %s1404_s16  ;;  %v535_v15 = vpack.c.bf16 %v507_v12, %v507_v12 }
  0xc9   : > { %515 = vrot.lane.b32.xlu2 %v471_v14, %s1403_s20  ;;  %v521_v19 = vpack.c.bf16 %v471_v14, %v471_v14 }
  0xca   : > { %v558_v16 = vsel %vm553_vm1, %v535_v15, 0 }
  0xcb   : > { %567 = vmatpush.bf16.xpose.msra.mxu2 %v558_v16 }
  0xcd   : > { %v508_v17 = vpop.f32.mrf.mxu1 }
  0xce   : > { %v1612_v18 = vadd.f32 %v1131_v9, %v508_v17  ;;  %v472_v20 = vpop.f32.mrf.mxu0 }
  0xd0   : > { %532 = vrot.lane.b32.xlu1 %v507_v12, %s1405_s13  ;;  %512 = vrot.lane.b32.xlu0 %v471_v14, %s1404_s16  ;;  %v549_v21 = vpack.c.bf16 %v1612_v18, %v1612_v18 }
  0xd1   : > { %518 = vrot.lane.b32.xlu2 %v471_v14, %s1405_s13 }
  0xd2   : > { %v683_v22 = vsel %vm681_vm2, %v549_v21, 0  ;;  %995 = vmatmul.msk.bf16.vlgmr.msra.gmra.mxu2 %vm553_vm1, %v521_v19 }
  0xd3   : > { %692 = vmatpush.bf16.msrb.mxu2 %v683_v22 }
 0x123   : > { %v516_v29 = vpop.permute.xlu2 %515 }
 0x124   : > { %v523_v32 = vpack.c.bf16 %v516_v29, %v516_v29 }
 0x12b   : > { %v519_v36 = vpop.permute.xlu2 %518 }
 0x12c   : > { %v524_v37 = vpack.c.bf16 %v519_v36, %v519_v36 }
 0x13a   : > { %v530_v23 = vpop.permute.xlu1 %529  ;;  %v527_v24 = vpop.permute.xlu0 %526 }
 0x13b   : > { %v537_v25 = vpack.c.bf16 %v530_v23, %v530_v23  ;;  %v536_v26 = vpack.c.bf16 %v527_v24, %v527_v24 }
 0x13d   : > { %v577_v27 = vsel %vm553_vm1, %v536_v26, 0  ;;  %v596_v28 = vsel %vm553_vm1, %v537_v25, 0 }
 0x13e   : > { %586 = vmatpush.bf16.xpose.msra.mxu3 %v577_v27  ;;  %605 = vmatpush.bf16.xpose.msrb.mxu0 %v596_v28 }
 0x142   : > { %v533_v30 = vpop.permute.xlu1 %532  ;;  %v513_v31 = vpop.permute.xlu0 %512 }
 0x143   : > { %v538_v33 = vpack.c.bf16 %v533_v30, %v533_v30  ;;  %v522_v34 = vpack.c.bf16 %v513_v31, %v513_v31 }
 0x145   : > { %996 = vmatmul.msk.bf16.vlgmr.msra.gmra.mxu3 %vm553_vm1, %v522_v34  ;;  %997 = vmatmul.msk.bf16.vlgmr.msrb.gmra.mxu0 %vm553_vm1, %v523_v32  ;;  %v615_v35 = vsel %vm553_vm1, %v538_v33, 0 }
 0x146   : > { %624 = vmatpush.bf16.xpose.msrb.mxu1 %v615_v35 }
 0x14d   : > { %998 = vmatmul.msk.bf16.vlgmr.msrb.gmra.mxu1 %vm553_vm1, %v524_v37 }
 0x155   : > { %v569_v38 = vpop.f32.mrf.mxu2 }
 0x156   : > { %v630_v49 = vsel %vm553_vm1, %v569_v38, -inf }
 0x15d   : > { %v571_v39 = vpop.f32.mrf.mxu2 }
 0x15e   : > { %v1022_v39 = vld [vmem:[#allocation10 + $0x8] sm:$0xff] }
 0x15f   : > { %802 = vmatpush.bf16.msra.mxu2 %v1022_v39 }
 0x1c2   : > { %v607_v40 = vpop.f32.mrf.mxu0 }
 0x1c3   : > { %v636_v41 = vsel %vm553_vm1, %v607_v40, -inf }
 0x1c4   : > { %637 = vmax.xlane.f32.xlu1 %v636_v41 }
 0x1c8   : > { %v588_v42 = vpop.f32.mrf.mxu3 }
 0x1c9   : > { %v633_v43 = vsel %vm553_vm1, %v588_v42, -inf }
 0x1ca   : > { %v609_v44 = vpop.f32.mrf.mxu0  ;;  %v626_v45 = vpop.f32.mrf.mxu1  ;;  %634 = vmax.xlane.f32.xlu0 %v633_v43 }
 0x1cb   : > { %v639_v46 = vsel %vm553_vm1, %v626_v45, -inf }
 0x1cc   : > { %640 = vmax.xlane.f32.xlu2 %v639_v46 }
 0x1d0   : > { %v590_v47 = vpop.f32.mrf.mxu3 }
 0x1d2   : > { %v628_v48 = vpop.f32.mrf.mxu1 }
 0x1d3   : > { %v1133_v48 = vld [vmem:[%s1701_s7] ss:$0 sm:$0xff] }
 0x1d4   : > { %631 = vmax.xlane.f32.xlu2 %v630_v49 }
 0x1dd   : > { %540 = vrot.lane.b32.xlu1 %v1612_v18, %s1404_s16 }
 0x237   : > { %v638_v50 = vpop.xlane.xlu1 %637 }
 0x238   : > { %v644_v51 = vsub.f32 %v607_v40, %v638_v50  ;;  %v1021_v40 = vld [vmem:[#allocation10] sm:$0xff] }
 0x239   : > { %803 = vmatpush.bf16.msra.mxu2 %v1021_v40 }
 0x23a   : > { %v650_v52 = vmul.f32 1.442695, %v644_v51 }
 0x23c   : > { %1134 = vpow2.f32 %v650_v52 }
 0x23d   : > { %v635_v53 = vpop.xlane.xlu0 %634 }
 0x23e   : > { %v643_v57 = vsub.f32 %v588_v42, %v635_v53 }
 0x23f   : > { %v641_v54 = vpop.xlane.xlu2 %640 }
 0x240   : > { %v645_v55 = vsub.f32 %v626_v45, %v641_v54  ;;  %v648_v60 = vmul.f32 1.442695, %v643_v57 }
 0x242   : > { %v1135_v56 = vpop.eup %1134  ;;  %v652_v58 = vmul.f32 1.442695, %v645_v55 }
 0x243   : > { %v660_v59 = vsel %vm553_vm1, %v1135_v56, 0.0 }
 0x244   : > { %1136 = vpow2.f32 %v652_v58  ;;  %661 = vadd.xlane.f32.xlu2 %v660_v59 }
 0x245   : > { %1138 = vpow2.f32 %v648_v60 }
 0x247   : > { %v632_v61 = vpop.xlane.xlu2 %631 }
 0x248   : > { %v642_v62 = vsub.f32 %v569_v38, %v632_v61 }
 0x24a   : > { %v1137_v63 = vpop.eup %1136  ;;  %v646_v0 = vmul.f32 1.442695, %v642_v62 }
 0x24b   : > { %v663_v1 = vsel %vm553_vm1, %v1137_v63, 0.0  ;;  %v1139_v3 = vpop.eup %1138 }
 0x24c   : > { %1140 = vpow2.f32 %v646_v0  ;;  %664 = vadd.xlane.f32.xlu0 %v663_v1  ;;  %v657_v7 = vsel %vm553_vm1, %v1139_v3, 0.0 }
 0x24f   : > { %v541_v2 = vpop.permute.xlu1 %540 }
 0x250   : > { %v550_v4 = vpack.c.bf16 %v541_v2, %v541_v2 }
 0x252   : > { %v1141_v5 = vpop.eup %1140  ;;  %v702_v6 = vsel %vm681_vm2, %v550_v4, 0 }
 0x253   : > { %711 = vmatpush.bf16.msrb.mxu3 %v702_v6  ;;  %v654_v8 = vsel %vm553_vm1, %v1141_v5, 0.0 }
 0x254   : > { %658 = vadd.xlane.f32.xlu0 %v657_v7  ;;  %655 = vadd.xlane.f32.xlu1 %v654_v8 }
 0x25c   : > { %543 = vrot.lane.b32.xlu2 %v1612_v18, %s1403_s20 }
 0x268   : > { %546 = vrot.lane.b32.xlu0 %v1612_v18, %s1405_s13 }
 0x2b7   : > { %v662_v9 = vpop.xlane.xlu2 %661 }
 0x2b8   : > { %1142 = vrcp.f32 %v662_v9 }
 0x2be   : > { %v1143_v10 = vpop.eup %1142 }
 0x2bf   : > { %v665_v11 = vpop.xlane.xlu0 %664  ;;  %v544_v12 = vpop.permute.xlu2 %543  ;;  %v672_v13 = vmul.f32 %v1143_v10, %v1135_v56 }
 0x2c0   : > { %v551_v14 = vpack.c.bf16 %v544_v12, %v544_v12 }
 0x2c1   : > { %v676_v16 = vpack.c.bf16 %v672_v13, %v672_v13 }
 0x2c2   : > { %v721_v15 = vsel %vm681_vm2, %v551_v14, 0 }
 0x2c3   : > { %730 = vmatpush.bf16.msra.mxu0 %v721_v15 }
 0x2c6   : > { %1001 = vmatmul.msk.bf16.vlgmr.msra.gmra.mxu0 %vm553_vm1, %v676_v16 }
 0x2c7   : > { %v659_v17 = vpop.xlane.xlu0 %658  ;;  %v656_v19 = vpop.xlane.xlu1 %655 }
 0x2c8   : > { %1144 = vrcp.f32 %v659_v17 }
 0x2c9   : > { %1146 = vrcp.f32 %v656_v19 }
 0x2ca   : > { %1148 = vrcp.f32 %v665_v11 }
 0x2ce   : > { %v1145_v20 = vpop.eup %1144 }
 0x2cf   : > { %v1147_v21 = vpop.eup %1146  ;;  %v671_v18 = vmul.f32 %v1145_v20, %v1139_v3 }
 0x2d0   : > { %v670_v22 = vmul.f32 %v1147_v21, %v1141_v5  ;;  %v1149_v25 = vpop.eup %1148 }
 0x2d1   : > { %v675_v23 = vpack.c.bf16 %v671_v18, %v671_v18  ;;  %v673_v27 = vmul.f32 %v1149_v25, %v1137_v63 }
 0x2d2   : > { %v674_v24 = vpack.c.bf16 %v670_v22, %v670_v22 }
 0x2d3   : > { %1000 = vmatmul.msk.bf16.vlgmr.msrb.gmra.mxu3 %vm553_vm1, %v675_v23  ;;  %v677_v30 = vpack.c.bf16 %v673_v27, %v673_v27 }
 0x2d4   : > { %999 = vmatmul.msk.bf16.vlgmr.msrb.gmra.mxu2 %vm553_vm1, %v674_v24 }
 0x2da   : > { %v547_v26 = vpop.permute.xlu0 %546 }
 0x2db   : > { %v552_v28 = vpack.c.bf16 %v547_v26, %v547_v26 }
 0x2dd   : > { %v740_v29 = vsel %vm681_vm2, %v552_v28, 0 }
 0x2de   : > { %749 = vmatpush.bf16.msra.mxu1 %v740_v29 }
 0x2e1   : > { %1002 = vmatmul.msk.bf16.vlgmr.msra.gmra.mxu1 %vm553_vm1, %v677_v30 }
 0x343   : > { %v732_v31 = vpop.f32.mrf.mxu0 }
 0x344   : > { %760 = vrot.lane.b32.xlu2 %v732_v31, %s1406_s12 }
 0x34b   : > { %v734_v32 = vpop.f32.mrf.mxu0 }
 0x356   : > { %v713_v33 = vpop.f32.mrf.mxu3 }
 0x357   : > { %v694_v34 = vpop.f32.mrf.mxu2  ;;  %756 = vrot.lane.b32.xlu0 %v713_v33, %s1407_s19 }
 0x35e   : > { %v715_v35 = vpop.f32.mrf.mxu3  ;;  %v751_v36 = vpop.f32.mrf.mxu1 }
 0x35f   : > { %v696_v37 = vpop.f32.mrf.mxu2  ;;  %764 = vrot.lane.b32.xlu0 %v751_v36, %s1408_s14 }
 0x366   : > { %v753_v38 = vpop.f32.mrf.mxu1 }
 0x39e   : > { %v761_v43 = vpop.permute.xlu2 %760 }
 0x3c9   : > { %v757_v41 = vpop.permute.xlu0 %756 }
 0x3ca   : > { %v767_v42 = vsel %vm553_vm1, %v694_v34, %v757_v41 }
 0x3cb   : > { %v769_v45 = vsel %vm768_vm3, %v767_v42, %v761_v43 }
 0x3d1   : > { %v765_v44 = vpop.permute.xlu0 %764 }
 0x3d2   : > { %v771_v46 = vsel %vm770_vm4, %v769_v45, %v765_v44 }
 0x3d3   : > { %v772_v47 = vpack.c.bf16 %v771_v46, %v771_v46 }
 0x3d5   : > { %1011 = vmatmul.msk.bf16.vlgmr.msra.gmra.mxu2 %vm457_vm0, %v772_v47 }
 0x458   : > { %v805_v49 = vpop.f32.mrf.mxu2 }
 0x459   : > { %v806_v50 = vadd.f32 %v1133_v48, %v805_v49 }
 0x45b   : > { %809 = vst.msk [vmem:[%s430_s17] sm:$0xff] %vm457_vm0, %v806_v50 }
 0x45c   : > { %1327 = shalt.err (!%p1324_p13)
}
 0x45d   : > { %1039 = dma.vmem_to_hbm [thread:$0]  (%p1541_p4), %s825_s24, 128, %s827_s11, %s811_s30  }
 0x460   : > { %v807_v51 = vpop.f32.mrf.mxu2 }
 0x461 PF: > { %s838_s12 = sand.u32 1, %s1374_s27   ;;  %p1059_p0 = pnand %p964_p6, %p1549_p7 }
 0x462   : > { %s839_s19 = scalar_lea.sflag [#allocation4], %s838_s12 }
 0x463   : > { %p1060_p2 = pneg %p1059_p0 }
 0x465   : > { %1369 = dma.done.wait (%p1060_p2), %s839_s19, 128  }
 0x466   : > { %1371 = vsyncadd (%p1060_p2), %s839_s19, 4294967168  ;;  %s28_s10 = sadd.s32 1, %s1394_s10   ;;  %s1726_s14 = sld [smem:[#allocation17_spill]] }
 0x467   : > { %p25_p5 = scmp.ge.s32.totalorder %s28_s10, 4   ;;  %s1727_s29 = sld [smem:[#allocation19_spill]] }
 0x468   : > { %s1728_s23 = sld [smem:[#allocation18_spill]]  ;;  %s1729_s27 = smov %s1378_s28 }
 0x469   : > { %s1731_s30 = smov %s1390_s9 }
 0x46a   :  { %27 = sbr.rel (!%p25_p5) target bundleno = 14 (0xe), region = 122 }
 0x46c   : > { %s1730_s28 = smov %s1726_s14 }
 0x46e   : > { %s1732_s9 = smov %s1728_s23 }
 0x46f   :  { %845 = vsyncpa [#allocation3], 1 }
 0x470   :  { %847 = vsyncpa [#allocation3 + $0x1], 1 }
 0x471   :  { %848 = vsyncpa [#allocation6], 1 }
 0x472   :  { %850 = vsyncpa [#allocation6 + $0x1], 1 }
 0x473   :  { %851 = vsyncpa [#allocation9], 1 }
 0x474   :  { %852 = vsyncpa [#allocation4], 1 }
 0x475   :  { %854 = vsyncpa [#allocation4 + $0x1], 1 }

</bundles_post_ra>
